<compile_context>
chip_gen: v7x
topology: tpu7x:2x2x1
jax: 0.10.0
libtpu: 0.0.40
codegen_flags: <defaults>
</compile_context>

<pallas_src>
import jax
import jax.numpy as jnp
import numpy as np
from jax.experimental import pallas as pl
from jax.experimental.pallas import tpu as pltpu

# ---- static config ---------------------------------------------------------
ACTIONS = ["Move forward", "Turn right", "Turn left", "Stop moving"]
NUM_ACTIONS = len(ACTIONS)
IMG_H, IMG_W, IMG_C = 16, 16, 3
FEAT_RAW = IMG_H * IMG_W * IMG_C          # 768 = 6 * 128, tile-legal, no pad
W_LANES = 8                                # actions live in lanes 0..3
LANES = 128                                # lane-dense output slab width
ACTION_DIM = 3                             # (vx, vy, wz)
MAX_BATCH_TILE = 512                       # per-grid-step batch tile

# action_map from the PyTorch module (kept in f32 so emitted velocities are
# bit-exact: 0.6 / 0.5 are not bf16-exact).
# TODO(synk): 'Stop moving' is in self.actions but absent from action_map in
# the original (would KeyError); we map it to zeros here.
ACTION_TABLE_DENSE = jnp.array(
    [[0.6, 0.0, 0.0],      # Move forward
     [0.0, 0.0, -0.5],     # Turn right
     [0.0, 0.0, 0.5],      # Turn left
     [0.0, 0.0, 0.0]],     # Stop moving (see TODO above)
    dtype=jnp.float32)


# ---- Pallas kernel ----------------------------------------------------------
def vln_action_kernel(x_ref, w_ref, out_ref):
    """Score actions for a batch tile and emit one lane-dense result slab.

    x_ref:   (BT, 768) bf16  flattened composite-image pixels
    w_ref:   (768, 8)  bf16  per-action scoring weights (lanes 0..3 real)
    out_ref: (BT, 128) f32   lanes 0..2 = velocity command, lane 3 = action idx
    """
    # Single small MXU matmul; f32 accumulation.
    scores = jnp.dot(x_ref[...], w_ref[...],
                     preferred_element_type=jnp.float32)          # (BT, 8)

    # Argmax over the 4 real action lanes, first-index tie-break.
    lane = jax.lax.broadcasted_iota(jnp.int32, scores.shape, 1)    # (BT, 8)
    masked = jnp.where(lane < NUM_ACTIONS, scores, -jnp.inf)
    m = jnp.max(masked, axis=1, keepdims=True)                     # (BT, 1)
    idx_f = jnp.min(
        jnp.where(masked >= m, lane.astype(jnp.float32),
                  jnp.float32(NUM_ACTIONS)),
        axis=1, keepdims=True)                                     # (BT, 1)
    # Guard NaN / all -inf rows: clamp into the valid action range.
    idx_f = jnp.minimum(idx_f, jnp.float32(NUM_ACTIONS - 1))

    # Velocity components via VPU selects against compile-time f32 constants
    # (replaces the former onehot @ table HIGHEST-precision matmul).
    vx = jnp.where(idx_f == 0.0, jnp.float32(0.6), jnp.float32(0.0))   # fwd
    wz = jnp.where(idx_f == 1.0, jnp.float32(-0.5),
                   jnp.where(idx_f == 2.0, jnp.float32(0.5),
                             jnp.float32(0.0)))                        # turns
    # vy is 0.0 for every action -> lane 1 stays zero.

    out_lane = jax.lax.broadcasted_iota(jnp.int32, out_ref.shape, 1)   # (BT,128)
    out = jnp.where(out_lane == 0, vx, jnp.float32(0.0))
    out = jnp.where(out_lane == 2, wz, out)
    out = jnp.where(out_lane == 3, idx_f, out)
    out_ref[...] = out


def _run_action_kernel(x, w, batch_tile):
    b_pad = x.shape[0]
    grid = (b_pad // batch_tile,)
    return pl.pallas_call(
        vln_action_kernel,
        out_shape=jax.ShapeDtypeStruct((b_pad, LANES), jnp.float32),
        grid=grid,
        in_specs=[
            pl.BlockSpec((batch_tile, FEAT_RAW), lambda b: (b, 0)),
            pl.BlockSpec((FEAT_RAW, W_LANES), lambda b: (0, 0)),
        ],
        out_specs=pl.BlockSpec((batch_tile, LANES), lambda b: (b, 0)),
        compiler_params=pltpu.CompilerParams(
            dimension_semantics=("parallel",)),
    )(x, w)


# ---- jitted tensor path (flatten + kernel + slices in ONE executable) -------
@jax.jit
def _vln_policy(w, images):
    """images: (B, H, W, C) -> (velocities (B, 3) f32, action index (B,) i32)."""
    b = images.shape[0]
    flat = images.reshape(b, -1).astype(jnp.bfloat16)   # 0..255 exact in bf16
    assert flat.shape[1] == FEAT_RAW

    b8 = -(-b // 8) * 8                       # round batch up to sublane mult
    if b8 >= 16:
        # Megacore-aware: >= 2 "parallel" grid steps so v7x can use both TCs.
        batch_tile = min(MAX_BATCH_TILE, -(-(b8 // 2) // 8) * 8)
    else:
        batch_tile = b8
    b_pad = -(-b8 // batch_tile) * batch_tile  # multiple of the batch tile

    x = flat if b_pad == b else jnp.pad(flat, ((0, b_pad - b), (0, 0)))
    out = _run_action_kernel(x, w, batch_tile)
    vel = out[:b, :ACTION_DIM]
    idx = out[:b, ACTION_DIM].astype(jnp.int32)
    return vel, idx


# ---- parameter setup (deterministic, in-script) -----------------------------
def init_params(key):
    (kw,) = jax.random.split(key, 1)
    # Per-action scoring weights of the synthetic policy head: one tiny
    # (768, 8) bf16 tile, actions in lanes 0..3, lanes 4..7 zero.
    w_dense = jax.random.normal(kw, (NUM_ACTIONS, FEAT_RAW),
                                dtype=jnp.float32) * 0.02
    w = jnp.zeros((FEAT_RAW, W_LANES), jnp.float32).at[:, :NUM_ACTIONS].set(
        w_dense.T).astype(jnp.bfloat16)
    # dummy_param from the PyTorch module (unused in forward, kept for parity)
    dummy_param = jnp.zeros((1,), jnp.float32)
    return {"w": w, "dummy_param": dummy_param}


# ---- forward wrappers -------------------------------------------------------
def vln_forward_batch(params, instruction_text, composite_images_hwc,
                      history_actions):
    """Batched stand-in for VLNModel.forward: one pallas_call for B images.

    Returns (action_tensors (B, 3), best_actions list[str], prompt_text str,
             raw_responses list[str]).
    """
    vel, idx = _vln_policy(params["w"], composite_images_hwc)
    idx_host = jax.device_get(idx)
    best_actions = [ACTIONS[int(i)] for i in idx_host]

    # TODO(synk): LLM instruction decomposition, VLM scene description, cv2
    # JPEG/base64 image encoding, reasoning-prompt construction and response
    # parsing are remote API / CPU string ops with no Pallas equivalent.
    prompt_text = (f"Navigation Task: {instruction_text}\n"
                   f"History Actions: {history_actions}")
    raw_responses = [
        ("Subtasks Completed: No\nReasoning: synthetic policy head\n"
         f"Current Action: {a}") for a in best_actions]
    return vel, best_actions, prompt_text, raw_responses


def vln_forward(params, instruction_text, composite_image_hwc, history_actions):
    """Mirrors VLNModel.forward's return signature for a single image:
       (action_tensor (1, 3), best_action str, prompt_text str, raw_response str)
    """
    vel, actions, prompt_text, raws = vln_forward_batch(
        params, instruction_text, composite_image_hwc[None], history_actions)
    return vel[0:1], actions[0], prompt_text, raws[0]


# ---- demo -------------------------------------------------------------------
if __name__ == "__main__":
    key = jax.random.PRNGKey(0)
    k_img, k_param = jax.random.split(key)
    params = init_params(k_param)

    # Batch of small composite RGB images, HWC = (16, 16, 3), values in [0, 255).
    B = 8
    images = jax.random.uniform(k_img, (B, IMG_H, IMG_W, IMG_C),
                                dtype=jnp.float32, minval=0.0, maxval=255.0)

    # Batched path: one pallas_call scores the whole batch.
    action_tensors, best_actions, prompt_text, raw_responses = vln_forward_batch(
        params,
        instruction_text="Go to the kitchen and grab a glass of water.",
        composite_images_hwc=images,
        history_actions=["Move forward"],
    )
    jax.block_until_ready(action_tensors)

    # Single-image path mirroring the original forward() signature.
    action_tensor, best_action, _, _ = vln_forward(
        params, "Go to the kitchen and grab a glass of water.",
        images[0], ["Move forward"])
    jax.block_until_ready(action_tensor)

    # ---- pure-JAX reference check (same bf16 inputs as the kernel) ----------
    flat_ref = images.reshape(B, -1).astype(jnp.bfloat16)
    ref_scores = jnp.dot(flat_ref, params["w"][:, :NUM_ACTIONS],
                         preferred_element_type=jnp.float32)
    ref_idx = jnp.argmax(ref_scores, axis=1)
    ref_vel = ACTION_TABLE_DENSE[ref_idx]

    assert action_tensors.shape == (B, ACTION_DIM)
    assert action_tensor.shape == (1, ACTION_DIM)
    assert all(a in ACTIONS for a in best_actions)
    assert best_action in ACTIONS
    np.testing.assert_array_equal(
        np.asarray(jax.device_get(ref_idx)),
        np.asarray([ACTIONS.index(a) for a in best_actions]))
    np.testing.assert_allclose(np.asarray(action_tensors),
                               np.asarray(ref_vel), rtol=0.0, atol=1e-6)
    np.testing.assert_allclose(np.asarray(action_tensor),
                               np.asarray(action_tensors[0:1]),
                               rtol=0.0, atol=1e-6)

    print("KERNEL_OK")
</pallas_src>

<mosaic_0001>
module attributes {stable_mosaic.version = 11 : i64} {
  func.func @vln_action_kernel(%arg0: i32, %arg1: memref<8x768xbf16, #tpu.memory_space<vmem>>, %arg2: memref<768x8xbf16, #tpu.memory_space<vmem>>, %arg3: memref<8x128xf32, #tpu.memory_space<vmem>>) attributes {dimension_semantics = [#tpu.dimension_semantics<parallel>], iteration_bounds = array<i64: 1>, scalar_prefetch = 0 : i64, scratch_operands = 0 : i64, tpu.core_type = #tpu.core_type<tc>, window_params = [{transform_indices = @transform_0, window_bounds = array<i64: 8, 768>}, {pipeline_mode = #tpu.pipeline_mode<synchronous>, transform_indices = @transform_1, window_bounds = array<i64: 768, 8>}, {transform_indices = @transform_2, window_bounds = array<i64: 8, 128>}]} {
    %c0 = arith.constant 0 : index
    %c0_0 = arith.constant 0 : index
    %0 = vector.load %arg1[%c0, %c0_0] : memref<8x768xbf16, #tpu.memory_space<vmem>>, vector<8x768xbf16>
    %c0_1 = arith.constant 0 : index
    %c0_2 = arith.constant 0 : index
    %1 = vector.load %arg2[%c0_1, %c0_2] : memref<768x8xbf16, #tpu.memory_space<vmem>>, vector<768x8xbf16>
    %cst = arith.constant dense<0.000000e+00> : vector<8x8xf32>
    %2 = tpu.matmul %0, %1, %cst {dimension_numbers = #tpu.dot_dimension_numbers<[1], [0], [0], [1], [0, 0, 1, 1], [], []>} : vector<8x768xbf16>, vector<768x8xbf16>, vector<8x8xf32> -> vector<8x8xf32>
    %3 = tpu.iota {dimensions = array<i32: 1>} : vector<8x8xi32>
    %c4_i32 = arith.constant 4 : i32
    %4 = vector.broadcast %c4_i32 : i32 to vector<8x8xi32>
    %5 = arith.cmpi slt, %3, %4 : vector<8x8xi32>
    %cst_3 = arith.constant 0xFF800000 : f32
    %6 = vector.broadcast %cst_3 : f32 to vector<8x8xf32>
    %7 = arith.select %5, %2, %6 : vector<8x8xi1>, vector<8x8xf32>
    %cst_4 = arith.constant dense<0xFF800000> : vector<8xf32>
    %8 = vector.multi_reduction <maximumf>, %7, %cst_4 [1] : vector<8x8xf32> to vector<8xf32>
    %9 = vector.shape_cast %8 : vector<8xf32> to vector<8x1xf32>
    %10 = vector.broadcast %9 : vector<8x1xf32> to vector<8x8xf32>
    %11 = arith.cmpf oge, %7, %10 : vector<8x8xf32>
    %12 = arith.sitofp %3 : vector<8x8xi32> to vector<8x8xf32>
    %cst_5 = arith.constant 4.000000e+00 : f32
    %13 = vector.broadcast %cst_5 : f32 to vector<8x8xf32>
    %14 = arith.select %11, %12, %13 : vector<8x8xi1>, vector<8x8xf32>
    %cst_6 = arith.constant dense<0x7F800000> : vector<8xf32>
    %15 = vector.multi_reduction <minimumf>, %14, %cst_6 [1] : vector<8x8xf32> to vector<8xf32>
    %16 = vector.shape_cast %15 : vector<8xf32> to vector<8x1xf32>
    %cst_7 = arith.constant 3.000000e+00 : f32
    %17 = vector.broadcast %cst_7 : f32 to vector<8x1xf32>
    %18 = arith.minimumf %16, %17 : vector<8x1xf32>
    %cst_8 = arith.constant 0.000000e+00 : f32
    %19 = vector.broadcast %cst_8 : f32 to vector<8x1xf32>
    %20 = arith.cmpf oeq, %18, %19 : vector<8x1xf32>
    %cst_9 = arith.constant 6.000000e-01 : f32
    %cst_10 = arith.constant 0.000000e+00 : f32
    %21 = vector.broadcast %cst_9 : f32 to vector<8x1xf32>
    %22 = vector.broadcast %cst_10 : f32 to vector<8x1xf32>
    %23 = arith.select %20, %21, %22 : vector<8x1xi1>, vector<8x1xf32>
    %cst_11 = arith.constant 1.000000e+00 : f32
    %24 = vector.broadcast %cst_11 : f32 to vector<8x1xf32>
    %25 = arith.cmpf oeq, %18, %24 : vector<8x1xf32>
    %cst_12 = arith.constant 2.000000e+00 : f32
    %26 = vector.broadcast %cst_12 : f32 to vector<8x1xf32>
    %27 = arith.cmpf oeq, %18, %26 : vector<8x1xf32>
    %cst_13 = arith.constant 5.000000e-01 : f32
    %cst_14 = arith.constant 0.000000e+00 : f32
    %28 = vector.broadcast %cst_13 : f32 to vector<8x1xf32>
    %29 = vector.broadcast %cst_14 : f32 to vector<8x1xf32>
    %30 = arith.select %27, %28, %29 : vector<8x1xi1>, vector<8x1xf32>
    %cst_15 = arith.constant -5.000000e-01 : f32
    %31 = vector.broadcast %cst_15 : f32 to vector<8x1xf32>
    %32 = arith.select %25, %31, %30 : vector<8x1xi1>, vector<8x1xf32>
    %33 = tpu.iota {dimensions = array<i32: 1>} : vector<8x128xi32>
    %c0_i32 = arith.constant 0 : i32
    %34 = vector.broadcast %c0_i32 : i32 to vector<8x128xi32>
    %35 = arith.cmpi eq, %33, %34 : vector<8x128xi32>
    %cst_16 = arith.constant 0.000000e+00 : f32
    %36 = vector.shape_cast %23 : vector<8x1xf32> to vector<8x1xf32>
    %37 = vector.broadcast %36 : vector<8x1xf32> to vector<8x128xf32>
    %38 = vector.broadcast %cst_16 : f32 to vector<8x128xf32>
    %39 = arith.select %35, %37, %38 : vector<8x128xi1>, vector<8x128xf32>
    %c2_i32 = arith.constant 2 : i32
    %40 = vector.broadcast %c2_i32 : i32 to vector<8x128xi32>
    %41 = arith.cmpi eq, %33, %40 : vector<8x128xi32>
    %42 = vector.shape_cast %32 : vector<8x1xf32> to vector<8x1xf32>
    %43 = vector.broadcast %42 : vector<8x1xf32> to vector<8x128xf32>
    %44 = arith.select %41, %43, %39 : vector<8x128xi1>, vector<8x128xf32>
    %c3_i32 = arith.constant 3 : i32
    %45 = vector.broadcast %c3_i32 : i32 to vector<8x128xi32>
    %46 = arith.cmpi eq, %33, %45 : vector<8x128xi32>
    %47 = vector.shape_cast %18 : vector<8x1xf32> to vector<8x1xf32>
    %48 = vector.broadcast %47 : vector<8x1xf32> to vector<8x128xf32>
    %49 = arith.select %46, %48, %44 : vector<8x128xi1>, vector<8x128xf32>
    %c0_17 = arith.constant 0 : index
    %c0_18 = arith.constant 0 : index
    %50 = vector.load %arg3[%c0_17, %c0_18] : memref<8x128xf32, #tpu.memory_space<vmem>>, vector<8x128xf32>
    tpu.vector_store %arg3[%c0_17, %c0_18], %49 {strides = array<i32>} : memref<8x128xf32, #tpu.memory_space<vmem>>, vector<8x128xf32>,
    return
  }
  func.func @transform_0(%arg0: i32) -> (i32, i32) {
    %c0_i32 = arith.constant 0 : i32
    %c0_i32_0 = arith.constant 0 : i32
    return %arg0, %c0_i32 : i32, i32
  }
  func.func @transform_1(%arg0: i32) -> (i32, i32) {
    %c0_i32 = arith.constant 0 : i32
    %c0_i32_0 = arith.constant 0 : i32
    %c0_i32_1 = arith.constant 0 : i32
    return %c0_i32, %c0_i32_0 : i32, i32
  }
  func.func @transform_2(%arg0: i32) -> (i32, i32) {
    %c0_i32 = arith.constant 0 : i32
    %c0_i32_0 = arith.constant 0 : i32
    return %arg0, %c0_i32 : i32, i32
  }
}

</mosaic_0001>

<bundles_post_ra>
// kernel: _vln_policy.1
= control target key start
LH: loop header
LB: loop body
LE: loop exit
PB: predicated region body
PF: predicated region fallthrough
CT: control target
= control target key end

     0   :  { %vm544_vm1 = vcmask 64512   ;;  %s919_s1 = inlined_call_operand.vmem [shape: bf16[768,8], index: 1, kind: input, shape index: {}]   ;;  %s920_s0 = inlined_call_operand.vmem [shape: bf16[8,768], index: 0, kind: input, shape index: {}]   ;;  %s921_s2 = inlined_call_operand.vmem [shape: f32[8,128], index: 2, kind: output, shape index: {}]  }
   0x1   :  { %v693_v0 = vld [vmem:[%s919_s1 + $0x40] sm:$0xff]   ;;  %v697_v4 = vld [vmem:[%s919_s1 + $0x48] sm:$0xff]   ;;  %v701_v8 = vld [vmem:[%s919_s1 + $0x50] sm:$0xff]  }
   0x2   :  { %v694_v1 = vld [vmem:[%s919_s1 + $0xc0] sm:$0xff]   ;;  %626 = vmatprep.subr.bf16.mxu0 %v693_v0  ;;  %v698_v5 = vld [vmem:[%s919_s1 + $0xc8] sm:$0xff]   ;;  %v702_v9 = vld [vmem:[%s919_s1 + $0xd0] sm:$0xff]  }
   0x3   :  { %v695_v2 = vld [vmem:[%s919_s1] sm:$0xff]   ;;  %648 = vmatprep.subr.bf16.mxu1 %v694_v1  ;;  %v699_v6 = vld [vmem:[%s919_s1 + $0x8] sm:$0xff]   ;;  %v703_v10 = vld [vmem:[%s919_s1 + $0x10] sm:$0xff]  }
   0x4   :  { %v696_v3 = vld [vmem:[%s919_s1 + $0x80] sm:$0xff]   ;;  %627 = vmatpush3.bf16.msra.mxu0 %v695_v2  ;;  %v700_v7 = vld [vmem:[%s919_s1 + $0x88] sm:$0xff]   ;;  %v704_v11 = vld [vmem:[%s919_s1 + $0x90] sm:$0xff]  }
   0x5   :  { %649 = vmatpush3.bf16.msra.mxu1 %v696_v3  ;;  %628 = vmatprep.subr.bf16.mxu0 %v697_v4  ;;  %v705_v12 = vld [vmem:[%s919_s1 + $0x58] sm:$0xff]   ;;  %v709_v16 = vld [vmem:[%s919_s1 + $0x60] sm:$0xff]   ;;  %v713_v20 = vld [vmem:[%s919_s1 + $0x68] sm:$0xff]   ;;  %v540_v4 = vlaneseq }
   0x6   :  { %650 = vmatprep.subr.bf16.mxu1 %v698_v5  ;;  %v706_v13 = vld [vmem:[%s919_s1 + $0xd8] sm:$0xff]   ;;  %v710_v17 = vld [vmem:[%s919_s1 + $0xe0] sm:$0xff]   ;;  %v714_v21 = vld [vmem:[%s919_s1 + $0xe8] sm:$0xff]  }
   0x7   :  { %v707_v14 = vld [vmem:[%s919_s1 + $0x18] sm:$0xff]   ;;  %v711_v18 = vld [vmem:[%s919_s1 + $0x20] sm:$0xff]   ;;  %v715_v22 = vld [vmem:[%s919_s1 + $0x28] sm:$0xff]   ;;  %v541_v5 = vand.u32 127, %v540_v4 }
   0x8   :  { %629 = vmatpush3.bf16.msra.mxu0 %v699_v6  ;;  %v708_v15 = vld [vmem:[%s919_s1 + $0x98] sm:$0xff]   ;;  %v712_v19 = vld [vmem:[%s919_s1 + $0xa0] sm:$0xff]   ;;  %v716_v23 = vld [vmem:[%s919_s1 + $0xa8] sm:$0xff]  }
   0x9   :  { %651 = vmatpush3.bf16.msra.mxu1 %v700_v7  ;;  %630 = vmatprep.subr.bf16.mxu0 %v701_v8  ;;  %v717_v24 = vld [vmem:[%s919_s1 + $0x70] sm:$0xff]   ;;  %v721_v28 = vld [vmem:[%s919_s1 + $0x78] sm:$0xff]   ;;  %v12_v32 = vld [vmem:[%s920_s0] sm:$0xff]  ;;  %vm542_vm0 = vcmp.lt.s32.totalorder %v541_v5, 4  ;;  %vm561_vm3 = vcmp.eq.s32.totalorder %v541_v5, 0  ;;  %vm563_vm4 = vcmp.eq.s32.totalorder %v541_v5, 2 }
   0xa   :  { %652 = vmatprep.subr.bf16.mxu1 %v702_v9  ;;  %v718_v25 = vld [vmem:[%s919_s1 + $0xf0] sm:$0xff]   ;;  %v722_v29 = vld [vmem:[%s919_s1 + $0xf8] sm:$0xff]   ;;  %v13_v33 = vld [vmem:[%s920_s0 + $0x8] sm:$0xff]  ;;  %v572_v34 = vcombine.low %v12_v32, %v12_v32  ;;  %v573_v35 = vcombine.high %v12_v32, %v12_v32  ;;  %vm565_vm8 = vcmp.eq.s32.totalorder %v541_v5, 3 }
   0xb   :  { %v719_v26 = vld [vmem:[%s919_s1 + $0x30] sm:$0xff]   ;;  %v723_v30 = vld [vmem:[%s919_s1 + $0x38] sm:$0xff]   ;;  %v574_v36 = vcombine.low %v13_v33, %v13_v33  ;;  %v575_v37 = vcombine.high %v13_v33, %v13_v33  ;;  %v729_v38 = vld [vmem:[%s919_s1 + $0x140] sm:$0xff]  }
   0xc   :  { %631 = vmatpush3.bf16.msra.mxu0 %v703_v10  ;;  %v720_v27 = vld [vmem:[%s919_s1 + $0xb0] sm:$0xff]   ;;  %v724_v31 = vld [vmem:[%s919_s1 + $0xb8] sm:$0xff]   ;;  %v730_v39 = vld [vmem:[%s919_s1 + $0x100] sm:$0xff]   ;;  %452 = vmatprep.mubr.bf16.mxu0 %v573_v35 }
   0xd   :  { %653 = vmatpush3.bf16.msra.mxu1 %v704_v11  ;;  %632 = vmatprep.subr.bf16.mxu0 %v705_v12  ;;  %v731_v40 = vld [vmem:[%s919_s1 + $0x148] sm:$0xff]   ;;  %v733_v42 = vld [vmem:[%s919_s1 + $0x150] sm:$0xff]   ;;  %v735_v44 = vld [vmem:[%s919_s1 + $0x158] sm:$0xff]  }
   0xe   :  { %654 = vmatprep.subr.bf16.mxu1 %v706_v13  ;;  %492 = vmatprep.mubr.bf16.mxu1 %v575_v37  ;;  %v732_v41 = vld [vmem:[%s919_s1 + $0x108] sm:$0xff]   ;;  %v734_v43 = vld [vmem:[%s919_s1 + $0x110] sm:$0xff]   ;;  %v736_v45 = vld [vmem:[%s919_s1 + $0x118] sm:$0xff]  }
   0xf   :  { %v737_v46 = vld [vmem:[%s919_s1 + $0x160] sm:$0xff]   ;;  %v14_v47 = vld [vmem:[%s920_s0 + $0x10] sm:$0xff]  ;;  %v739_v50 = vld [vmem:[%s919_s1 + $0x168] sm:$0xff]  }
  0x10   :  { %633 = vmatpush3.bf16.msra.mxu0 %v707_v14  ;;  %v577_v48 = vcombine.high %v14_v47, %v14_v47  ;;  %v738_v49 = vld [vmem:[%s919_s1 + $0x120] sm:$0xff]   ;;  %v740_v51 = vld [vmem:[%s919_s1 + $0x128] sm:$0xff]   ;;  %v741_v52 = vld [vmem:[%s919_s1 + $0x170] sm:$0xff]   ;;  %v576_v56 = vcombine.low %v14_v47, %v14_v47  ;;  %v549_v14 = vcvt.s32.f32 %v541_v5 }
  0x11   :  { %655 = vmatpush3.bf16.msra.mxu1 %v708_v15  ;;  %634 = vmatprep.subr.bf16.mxu0 %v709_v16  ;;  %v742_v53 = vld [vmem:[%s919_s1 + $0x130] sm:$0xff]   ;;  %v743_v54 = vld [vmem:[%s919_s1 + $0x178] sm:$0xff]  }
  0x12   :  { %656 = vmatprep.subr.bf16.mxu1 %v710_v17  ;;  %v744_v55 = vld [vmem:[%s919_s1 + $0x138] sm:$0xff]  }
  0x14   :  { %635 = vmatpush3.bf16.msra.mxu0 %v711_v18 }
  0x15   :  { %657 = vmatpush3.bf16.msra.mxu1 %v712_v19  ;;  %636 = vmatprep.subr.bf16.mxu0 %v713_v20  ;;  %v747_v20 = vmov 0.0  }
  0x16   :  { %658 = vmatprep.subr.bf16.mxu1 %v714_v21 }
  0x18   :  { %637 = vmatpush3.bf16.msra.mxu0 %v715_v22 }
  0x19   :  { %659 = vmatpush3.bf16.msra.mxu1 %v716_v23  ;;  %638 = vmatprep.subr.bf16.mxu0 %v717_v24 }
  0x1a   :  { %660 = vmatprep.subr.bf16.mxu1 %v718_v25 }
  0x1c   :  { %639 = vmatpush3.bf16.msra.mxu0 %v719_v26 }
  0x1d   :  { %661 = vmatpush3.bf16.msra.mxu1 %v720_v27  ;;  %640 = vmatprep.subr.bf16.mxu0 %v721_v28 }
  0x1e   :  { %662 = vmatprep.subr.bf16.mxu1 %v722_v29 }
  0x20   :  { %641 = vmatpush3.bf16.msra.mxu0 %v723_v30 }
  0x21   :  { %663 = vmatpush3.bf16.msra.mxu1 %v724_v31  ;;  %670 = vmatprep.subr.bf16.mxu0 %v729_v38 }
  0x23   :  { %453 = vmatmul.mubr.bf16.vlgmr.msra.gmra.mrb[0].mxu0 %v572_v34 }
  0x24   :  { %493 = vmatmul.mubr.bf16.vlgmr.msra.gmra.mrb[0].mxu1 %v574_v36  ;;  %671 = vmatpush3.bf16.msra.mxu0 %v730_v39 }
  0x25   :  { %672 = vmatprep.subr.bf16.mxu0 %v731_v40  ;;  %532 = vmatprep.mubr.bf16.mxu0 %v577_v48 }
  0x28   :  { %673 = vmatpush3.bf16.msra.mxu0 %v732_v41 }
  0x29   :  { %674 = vmatprep.subr.bf16.mxu0 %v733_v42 }
  0x2c   :  { %675 = vmatpush3.bf16.msra.mxu0 %v734_v43 }
  0x2d   :  { %676 = vmatprep.subr.bf16.mxu0 %v735_v44 }
  0x30   :  { %677 = vmatpush3.bf16.msra.mxu0 %v736_v45 }
  0x31   :  { %678 = vmatprep.subr.bf16.mxu0 %v737_v46 }
  0x34   :  { %679 = vmatpush3.bf16.msra.mxu0 %v738_v49 }
  0x35   :  { %680 = vmatprep.subr.bf16.mxu0 %v739_v50 }
  0x38   :  { %681 = vmatpush3.bf16.msra.mxu0 %v740_v51 }
  0x39   :  { %682 = vmatprep.subr.bf16.mxu0 %v741_v52 }
  0x3c   :  { %683 = vmatpush3.bf16.msra.mxu0 %v742_v53 }
  0x3d   :  { %684 = vmatprep.subr.bf16.mxu0 %v743_v54 }
  0x40   :  { %685 = vmatpush3.bf16.msra.mxu0 %v744_v55 }
  0x43   :  { %533 = vmatmul.mubr.bf16.vlgmr.msra.gmra.mrb[4].mxu0 %v576_v56 }
  0xf6   :  { %v642_v57 = vpop.f32.mrb[0].mxu0 }
  0xf7   :  { %v664_v58 = vpop.f32.mrb[0].mxu1  ;;  %v643_v59 = vpop.f32.mrb[1].mxu0 }
  0xf8   :  { %v665_v60 = vpop.f32.mrb[1].mxu1  ;;  %v644_v61 = vadd.f32 %v643_v59, %v642_v57  ;;  %v645_v63 = vpop.f32.mrb[2].mxu0 }
  0xf9   :  { %v666_v62 = vadd.f32 %v665_v60, %v664_v58  ;;  %v667_v0 = vpop.f32.mrb[2].mxu1  ;;  %v646_v1 = vpop.f32.mrb[3].mxu0 }
  0xfa   :  { %v668_v2 = vpop.f32.mrb[3].mxu1 }
  0xfb   :  { %v495_v3 = vadd.f32 %v666_v62, %v644_v61 }
 0x116   :  { %v686_v6 = vpop.f32.mrb[4].mxu0 }
 0x117   :  { %v687_v7 = vpop.f32.mrb[5].mxu0 }
 0x118   :  { %v688_v8 = vadd.f32 %v687_v7, %v686_v6  ;;  %v689_v9 = vpop.f32.mrb[6].mxu0 }
 0x119   :  { %v690_v10 = vpop.f32.mrb[7].mxu0 }
 0x11a   :  { %v535_v11 = vadd.f32 %v688_v8, %v495_v3 }
 0x11c   :  { %v543_v12 = vsel %vm542_vm0, %v535_v11, -inf }
 0x11d   :  { %v545_v13 = vsel %vm544_vm1, %v543_v12, -inf }
 0x11e   :  { %546 = vmax.xlane.f32.xlu0 %v545_v13 }
 0x1ab   :  { %v547_v15 = vpop.xlane.xlu0 %546 }
 0x1ac   :  { %vm548_vm2 = vcmp.ge.f32.partialorder %v543_v12, %v547_v15 }
 0x1ad   :  { %v550_v16 = vsel %vm548_vm2, %v549_v14, 4.0 }
 0x1ae   :  { %v551_v17 = vsel %vm544_vm1, %v550_v16, inf }
 0x1af   :  { %552 = vmin.xlane.f32.xlu0 %v551_v17 }
 0x23c   :  { %v553_v18 = vpop.xlane.xlu0 %552 }
 0x23d   :  { %v554_v19 = vmin.f32 %v553_v18, 3.0 }
 0x23f   :  { %vm555_vm5 = vcmp.eq.f32.partialorder %v554_v19, 0.0  ;;  %vm557_vm6 = vcmp.eq.f32.partialorder %v554_v19, 1.0  ;;  %vm558_vm7 = vcmp.eq.f32.partialorder %v554_v19, 2.0 }
 0x240   :  { %v556_v21 = vsel %vm555_vm5, 0.6, %v747_v20  ;;  %v559_v22 = vsel %vm558_vm7, 0.5, %v747_v20 }
 0x241   :  { %v560_v23 = vsel %vm557_vm6, -0.5, %v559_v22  ;;  %v562_v24 = vsel %vm561_vm3, %v556_v21, 0.0 }
 0x242   :  { %v564_v25 = vsel %vm563_vm4, %v560_v23, %v562_v24 }
 0x243   :  { %v566_v26 = vsel %vm565_vm8, %v554_v19, %v564_v25 }
 0x244   :  { %567 = vst [vmem:[%s921_s2] sm:$0xff] %v566_v26 }

</bundles_post_ra>
